<compile_context>
chip_gen: v5e
topology: v5e:2x2
jax: 0.10.0
libtpu: 0.0.40
codegen_flags: <defaults>
</compile_context>

<pallas_src>
import math
from functools import partial

import jax
import jax.numpy as jnp
from jax.experimental import pallas as pl
from jax.experimental.pallas import tpu as pltpu


def pe_add_kernel(x_ref, pe_ref, o_ref, *, scale):
    # x_ref : (ts, dim) rows of emb (leading axes squeezed / folded)
    # pe_ref: (ts, dim) matching pe rows, or (1, dim) single row (broadcast on the VPU)
    x = x_ref[...].astype(jnp.float32)
    p = pe_ref[...].astype(jnp.float32)
    o_ref[...] = (x * scale + p).astype(o_ref.dtype)


def _choose_row_tile(rows, dim, itemsize, *, target_block_bytes=2 << 20, sublane=8):
    """Rows per block sized by bytes (~target_block_bytes), multiple of 8 sublanes.

    Returns (ts, full) where full=True means the block covers all rows (full extent).
    """
    row_bytes = max(1, dim * itemsize)
    ts = max(sublane, (target_block_bytes // row_bytes) // sublane * sublane)
    if ts >= rows:
        return rows, True
    return ts, False


def positional_encoding(emb, pe, *, step=None):
    """emb: (batch, seq, dim); pe: (max_len, dim) sin/cos table.

    Returns emb * sqrt(dim) + pe[:seq]   (step is None)
         or emb * sqrt(dim) + pe[step]   (broadcast over batch & seq).
    """
    batch, seq, dim = emb.shape
    scale = math.sqrt(float(dim))
    emb_itemsize = jnp.dtype(emb.dtype).itemsize
    pe_itemsize = jnp.dtype(pe.dtype).itemsize

    if step is not None:
        # ---- decode/step path: fold (batch, seq) into one row axis, broadcast one pe row.
        rows = batch * seq
        emb2 = emb.reshape(rows, dim)
        pe_row = jax.lax.dynamic_slice_in_dim(pe, step, 1, axis=0)       # (1, dim)

        ts, _ = _choose_row_tile(rows, dim, emb_itemsize)
        n_tiles = pl.cdiv(rows, ts)

        cost = pl.CostEstimate(
            flops=int(2 * rows * dim),
            transcendentals=0,
            bytes_accessed=int(2 * rows * dim * emb_itemsize + dim * pe_itemsize),
        )

        out2 = pl.pallas_call(
            partial(pe_add_kernel, scale=scale),
            out_shape=jax.ShapeDtypeStruct((rows, dim), emb.dtype),
            grid_spec=pltpu.PrefetchScalarGridSpec(
                num_scalar_prefetch=0,
                grid=(n_tiles,),
                in_specs=[
                    pl.BlockSpec((ts, dim), lambda r: (r, 0)),
                    pl.BlockSpec((1, dim), lambda r: (0, 0)),   # stays resident in VMEM
                ],
                out_specs=pl.BlockSpec((ts, dim), lambda r: (r, 0)),
            ),
            compiler_params=pltpu.CompilerParams(
                dimension_semantics=("parallel",)),
            cost_estimate=cost,
        )(emb2, pe_row)
        return out2.reshape(batch, seq, dim)

    # ---- step=None path: per-position pe rows; batch innermost so pe blocks are reused.
    ts, full_rows = _choose_row_tile(seq, dim, emb_itemsize)
    n_seq_tiles = pl.cdiv(seq, ts)

    if full_rows and (seq % 8 != 0):
        # Block must either be a multiple of 8 rows or cover pe's full row extent; for an
        # odd small seq we slice once (tiny copy) so the pe block equals its full extent.
        pe_in = pe[:seq]
    else:
        pe_in = pe  # full table; index_map only touches blocks 0..n_seq_tiles-1

    cost = pl.CostEstimate(
        flops=int(2 * batch * seq * dim),
        transcendentals=0,
        bytes_accessed=int(2 * batch * seq * dim * emb_itemsize   # emb in + out
                           + seq * dim * pe_itemsize),            # pe read once
    )

    out = pl.pallas_call(
        partial(pe_add_kernel, scale=scale),
        out_shape=jax.ShapeDtypeStruct((batch, seq, dim), emb.dtype),
        grid_spec=pltpu.PrefetchScalarGridSpec(
            num_scalar_prefetch=0,
            grid=(n_seq_tiles, batch),                    # batch innermost -> pe reuse
            in_specs=[
                pl.BlockSpec((None, ts, dim), lambda s, b: (b, s, 0)),   # emb (batch squeezed)
                pl.BlockSpec((ts, dim), lambda s, b: (s, 0)),            # pe, constant over b
            ],
            out_specs=pl.BlockSpec((None, ts, dim), lambda s, b: (b, s, 0)),
        ),
        compiler_params=pltpu.CompilerParams(
            dimension_semantics=("parallel", "arbitrary")),
        cost_estimate=cost,
    )(emb, pe_in)
    return out


def build_pe_table(max_len, dim):
    """Sin/cos table identical to the PyTorch module's buffer."""
    position = jnp.arange(max_len, dtype=jnp.float32)[:, None]
    div_term = jnp.exp(
        jnp.arange(0, dim, 2, dtype=jnp.float32) * -(math.log(10000.0) / dim))
    pe = jnp.zeros((max_len, dim), jnp.float32)
    pe = pe.at[:, 0::2].set(jnp.sin(position * div_term))
    pe = pe.at[:, 1::2].set(jnp.cos(position * div_term))
    return pe


def reference_pe(emb, pe, step=None):
    dim = emb.shape[-1]
    scaled = emb * math.sqrt(float(dim))
    if step is None:
        return scaled + pe[: emb.shape[-2]]
    return scaled + pe[step]


if __name__ == "__main__":
    key = jax.random.PRNGKey(0)
    batch, seq, dim, max_len = 2, 8, 256, 64   # dim kept lane-dense (multiple of 128)

    emb = jax.random.normal(key, (batch, seq, dim), dtype=jnp.float32)
    pe = build_pe_table(max_len, dim)

    # step=None path (pe rows 0..seq-1)
    out = positional_encoding(emb, pe)
    out = jax.block_until_ready(out)
    ref = reference_pe(emb, pe)
    assert out.shape == emb.shape
    assert jnp.allclose(out, ref, atol=1e-5, rtol=1e-5), "mismatch vs reference (step=None)"

    # step path (single pe row broadcast over batch & seq)
    out_step = positional_encoding(emb, pe, step=3)
    out_step = jax.block_until_ready(out_step)
    ref_step = reference_pe(emb, pe, step=3)
    assert jnp.allclose(out_step, ref_step, atol=1e-5, rtol=1e-5), "mismatch vs reference (step)"

    print("KERNEL_OK")
</pallas_src>

<mosaic_0001>
module attributes {stable_mosaic.version = 11 : i64} {
  func.func @pe_add_kernel(%arg0: i32, %arg1: i32, %arg2: memref<1x8x256xf32, #tpu.memory_space<vmem>>, %arg3: memref<8x256xf32, #tpu.memory_space<vmem>>, %arg4: memref<1x8x256xf32, #tpu.memory_space<vmem>>) attributes {dimension_semantics = [#tpu.dimension_semantics<parallel>, #tpu.dimension_semantics<arbitrary>], iteration_bounds = array<i64: 1, 2>, scalar_prefetch = 0 : i64, scratch_operands = 0 : i64, tpu.core_type = #tpu.core_type<tc>, window_params = [{transform_indices = @transform_0, window_bounds = array<i64: 1, 8, 256>}, {transform_indices = @transform_1, window_bounds = array<i64: 8, 256>}, {transform_indices = @transform_2, window_bounds = array<i64: 1, 8, 256>}]} {
    %c0 = arith.constant 0 : index
    %c0_0 = arith.constant 0 : index
    %c0_1 = arith.constant 0 : index
    %0 = vector.load %arg2[%c0, %c0_0, %c0_1] : memref<1x8x256xf32, #tpu.memory_space<vmem>>, vector<1x8x256xf32>
    %1 = vector.shape_cast %0 : vector<1x8x256xf32> to vector<8x256xf32>
    %c0_2 = arith.constant 0 : index
    %c0_3 = arith.constant 0 : index
    %2 = vector.load %arg3[%c0_2, %c0_3] : memref<8x256xf32, #tpu.memory_space<vmem>>, vector<8x256xf32>
    %cst = arith.constant 1.600000e+01 : f32
    %3 = vector.broadcast %cst : f32 to vector<8x256xf32>
    %4 = arith.mulf %1, %3 : vector<8x256xf32>
    %5 = arith.addf %4, %2 : vector<8x256xf32>
    %c0_4 = arith.constant 0 : index
    %c0_5 = arith.constant 0 : index
    %c0_6 = arith.constant 0 : index
    %6 = vector.load %arg4[%c0_4, %c0_5, %c0_6] : memref<1x8x256xf32, #tpu.memory_space<vmem>>, vector<1x8x256xf32>
    %7 = vector.shape_cast %6 : vector<1x8x256xf32> to vector<8x256xf32>
    %8 = vector.shape_cast %5 : vector<8x256xf32> to vector<1x8x256xf32>
    tpu.vector_store %arg4[%c0_4, %c0_5, %c0_6], %8 {strides = array<i32>} : memref<1x8x256xf32, #tpu.memory_space<vmem>>, vector<1x8x256xf32>,
    return
  }
  func.func @transform_0(%arg0: i32, %arg1: i32) -> (i32, i32, i32) {
    %c0_i32 = arith.constant 0 : i32
    %c0_i32_0 = arith.constant 0 : i32
    return %arg1, %arg0, %c0_i32 : i32, i32, i32
  }
  func.func @transform_1(%arg0: i32, %arg1: i32) -> (i32, i32) {
    %c0_i32 = arith.constant 0 : i32
    %c0_i32_0 = arith.constant 0 : i32
    return %arg0, %c0_i32 : i32, i32
  }
  func.func @transform_2(%arg0: i32, %arg1: i32) -> (i32, i32, i32) {
    %c0_i32 = arith.constant 0 : i32
    %c0_i32_0 = arith.constant 0 : i32
    return %arg1, %arg0, %c0_i32 : i32, i32, i32
  }
}

</mosaic_0001>

<bundles_post_ra>
// kernel: tpu_custom_call.1
= control target key start
LH: loop header
LB: loop body
LE: loop exit
PB: predicated region body
PF: predicated region fallthrough
CT: control target
= control target key end

     0   :  { %7 = vsyncpa [#allocation3], 0  ;;  %s733_s0 = inlined_call_operand.hbm [shape: f32[2,8,256], index: 0, kind: input, shape index: {}]   ;;  %s734_s1 = inlined_call_operand.hbm [shape: f32[64,256], index: 1, kind: input, shape index: {}]   ;;  %s735_s2 = inlined_call_operand.hbm [shape: f32[2,8,256], index: 2, kind: output, shape index: {}]  }
   0x1   :  { %9 = vsyncpa [#allocation3 + $0x1], 0 }
   0x2   :  { %10 = vsyncpa [#allocation6], 0 }
   0x3   :  { %11 = vsyncpa [#allocation4], 0 }
   0x4   :  { %13 = vsyncpa [#allocation4 + $0x1], 0  ;;  %s584_s9 = smov 0   ;;  %s586_s10 = smov 0  }
   0x5   :  { %s588_s11 = smov 0   ;;  %s590_s12 = smov 0  }
   0x6   :  { %s592_s13 = smov 0   ;;  %s594_s14 = smov 0  }
   0x7 LB: > { %s328_s15 = sadd.s32 4294967295, %s566_s14   ;;  %s329_s16 = sadd.s32 4294967294, %s566_s14   ;;  %s566_s14 = sphi %s594_s14, %s19_s14   ;;  %s562_s13 = sphi %s592_s13, %s747_s13   ;;  %s558_s12 = sphi %s590_s12, %s746_s12   ;;  %s554_s11 = sphi %s588_s11, %s745_s11   ;;  %s550_s10 = sphi %s586_s10, %s744_s10   ;;  %s546_s9 = sphi %s584_s9, %s743_s9  }
   0x8   : > { %p53_p0 = scmp.ne.s32.totalorder %s550_s10, %s546_s9  ;;  %p618_p1 = scmp.eq.s32.totalorder %s328_s15, 0 }
   0x9   : > { %p622_p2 = scmp.eq.s32.totalorder %s328_s15, 1  ;;  %p111_p3 = scmp.eq.s32.totalorder %s329_s16, 1 }
   0xa   : > { %p628_p4 = por %p618_p1, %p53_p0  ;;  %p330_p5 = scmp.ge.s32.totalorder %s566_s14, 1 }
   0xb   : > { %p633_p6 = por %p111_p3, %p53_p0  ;;  %p118_p7 = scmp.lt.s32.totalorder %s566_s14, 3 }
   0xc   : > { %s133_s23 = sshll.u32 %s734_s1, 4  ;;  %p332_p9 = scmp.ge.s32.totalorder %s566_s14, 2  ;;  %s134_s23 = int_to_ptr.hbm [resolvable:$true] %s133_s23 }
   0xd   : > { %p641_p8 = pnand %p330_p5, %p118_p7  ;;  %s568_s25 = smov [#allocation5]  }
   0xe   : > { %s135_s26 = sshll.u32 %s568_s25, 4  ;;  %s28_s27 = sadd.s32 1, %s562_s13  ;;  %s136_s26 = int_to_ptr.vmem [resolvable:$true] %s135_s26 }
   0xf   : > { %p355_p10 = pneg %p641_p8  ;;  %p29_p12 = scmp.ge.s32.totalorder %s28_s27, 2 }
  0x10   : > { %s40_s28 = sadd.s32 1, %s554_s11  ;;  %p47_p13 = scmp.ne.s32.totalorder %s554_s11, %s550_s10 }
  0x11   : > { %p356_p11 = pnand %p355_p10, %p618_p1  ;;  %p48_p0 = scmp.eq.s32.totalorder %s566_s14, 0 }
  0x12   : > { %s749_s27 = smov (%p29_p12, %s28_s27), 0  ;;  %p663_p5 = por %p622_p2, %p47_p13 }
  0x13   : > { %358 = dma.hbm_to_vmem [thread:$0]  (!%p356_p11), %s134_s23, 256, %s136_s26, [#allocation6]  }
  0x14   : > { %p657_p3 = por %p48_p0, %p47_p13  ;;  %s35_s3 = ssub.s32 %s562_s13, %s749_s27 }
  0x15   : > { %p368_p7 = scmp.lt.s32.totalorder %s566_s14, 2  ;;  %p38_p10 = scmp.eq.s32.totalorder %s35_s3, 0 }
  0x16   : > { %s146_s4 = sand.u32 1, %s554_s11   ;;  %s345_s7 = sshll.u32 %s562_s13, 4 }
  0x17   : > { %s333_s5 = sshll.u32 %s146_s4, 4  ;;  %s157_s16 = scalar_lea.hbm %s733_s0, %s345_s7 }
  0x18   : > { %s672_s6 = scalar_select %p38_p10, %s554_s11, %s40_s28  }
  0x19   : > { %s150_s21 = scalar_lea.vmem [#allocation2], %s333_s5  ;;  %s159_s18 = sshll.u32 %s157_s16, 4  ;;  %s160_s18 = int_to_ptr.hbm [resolvable:$true] %s159_s18 }
  0x1a   : > { %s161_s22 = sshll.u32 %s150_s21, 4  ;;  %p360_p2 = pnand %p368_p7, %p657_p3  ;;  %s162_s22 = int_to_ptr.vmem [resolvable:$true] %s161_s22 }
  0x1b   : > { %s147_s23 = scalar_lea.sflag [#allocation3], %s146_s4  ;;  %170 = sbr.rel (%p641_p8) target bundleno = 50 (0x32), region = 28 }
  0x1c   : > { %362 = dma.hbm_to_vmem [thread:$0]  (!%p360_p2), %s160_s18, 256, %s162_s22, %s147_s23  }
  0x1d   : > { %s683_s25 = sand.u32 (!%p641_p8), 1, %s550_s10  }
  0x1e   : > { %s337_s26 = sshll.u32 (!%p641_p8), %s683_s25, 4  ;;  %s173_s28 = scalar_lea.sflag (!%p641_p8), [#allocation3], %s683_s25 }
  0x1f   : > { %s176_s3 = scalar_lea.vmem (!%p641_p8), [#allocation2], %s337_s26 }
  0x20   : > { %533 = dma.done.wait (%p628_p4), %s173_s28, 256  }
  0x21   : > { %535 = vsyncadd (%p628_p4), %s173_s28, 4294967040 }
  0x22   : > { %537 = dma.done.wait (%p618_p1), [#allocation6], 256  }
  0x23   : > { %539 = vsyncadd (%p618_p1), [#allocation6], 4294967040  ;;  %s346_s24 = sshll.u32 %s558_s12, 4  ;;  %v203_v0 = vld [vmem:[%s176_s3] sm:$0xff]  ;;  %v204_v2 = vld [vmem:[%s176_s3 + $0x8] sm:$0xff]  ;;  %s202_s7 = scalar_lea.vmem [#allocation7], %s337_s26 }
  0x24   : > { %s227_s5 = scalar_lea.hbm %s735_s2, %s346_s24  ;;  %v205_v1 = vld [vmem:[#allocation5] sm:$0xff]  ;;  %v207_v3 = vmul.f32 16.0, %v203_v0  ;;  %s229_s19 = sshll.u32 %s202_s7, 4  ;;  %v206_v4 = vld [vmem:[#allocation5 + $0x8] sm:$0xff]  ;;  %v208_v5 = vmul.f32 16.0, %v204_v2  ;;  %s230_s19 = int_to_ptr.vmem [resolvable:$true] %s229_s19 }
  0x25   : > { %s231_s8 = sshll.u32 %s227_s5, 4  ;;  %s214_s12 = scalar_lea.sflag [#allocation4], %s683_s25  ;;  %s232_s8 = int_to_ptr.hbm [resolvable:$true] %s231_s8 }
  0x26   : > { %v209_v6 = vadd.f32 %v207_v3, %v205_v1  ;;  %v210_v7 = vadd.f32 %v208_v5, %v206_v4  ;;  %s494_s17 = sshra.s32 %s232_s8, 4  ;;  %s500_s22 = scalar_lea.hbm %s735_s2, 32  ;;  %s495_s17 = int_to_ptr.hbm [resolvable:$true] %s494_s17 }
  0x27   : > { %s496_s15 = scalar_lea.hbm %s495_s17, 16  ;;  %p501_p11 = scmp.lt.s32.totalorder %s495_s17, %s735_s2 }
  0x28   : > { %211 = vst [vmem:[%s202_s7] sm:$0xff] %v209_v6  ;;  %p497_p1 = scmp.ne.s32.totalorder %s495_s17, %s496_s15  ;;  %p502_p12 = scmp.lt.s32.totalorder %s500_s22, %s496_s15 }
  0x29   : > { %212 = vst [vmem:[%s202_s7 + $0x8] sm:$0xff] %v210_v7 }
  0x2a   : > { %p498_p4 = pnand %p497_p1, %p663_p5  ;;  %p503_p13 = por %p502_p12, %p501_p11 }
  0x2c   : > { %p499_p8 = pneg %p498_p4 }
  0x2e   : > { %p504_p0 = pnand %p503_p13, %p499_p8 }
  0x30   : > { %507 = shalt.err (!%p504_p0)
}
  0x31   : > { %353 = dma.vmem_to_hbm [thread:$0]  (%p663_p5), %s230_s19, 256, %s232_s8, %s214_s12  }
  0x32 PF: > { %s243_s25 = sand.u32 1, %s546_s9   ;;  %p364_p3 = pnand %p332_p9, %p633_p6 }
  0x33   : > { %s244_s26 = scalar_lea.sflag [#allocation4], %s243_s25 }
  0x34   : > { %p365_p7 = pneg %p364_p3 }
  0x36   : > { %541 = dma.done.wait (%p365_p7), %s244_s26, 256  }
  0x37   : > { %543 = vsyncadd (%p365_p7), %s244_s26, 4294967040  ;;  %s19_s14 = sadd.s32 1, %s566_s14   ;;  %s743_s9 = smov %s550_s10 }
  0x38   : > { %p16_p10 = scmp.ge.s32.totalorder %s19_s14, 4   ;;  %s744_s10 = smov %s554_s11 }
  0x39   : > { %s745_s11 = smov %s672_s6  ;;  %s746_s12 = smov %s562_s13 }
  0x3a   : > { %s747_s13 = smov %s749_s27  ;;  %18 = sbr.rel (!%p16_p10) target bundleno = 7 (0x7), region = 78 }
  0x3f   :  { %250 = vsyncpa [#allocation3], 1 }
  0x40   :  { %252 = vsyncpa [#allocation3 + $0x1], 1 }
  0x41   :  { %253 = vsyncpa [#allocation6], 1 }
  0x42   :  { %254 = vsyncpa [#allocation4], 1 }
  0x43   :  { %256 = vsyncpa [#allocation4 + $0x1], 1 }

</bundles_post_ra>
